<compile_context>
chip_gen: v5e
topology: v5e:2x2
jax: 0.10.0
libtpu: 0.0.40
codegen_flags: <defaults>
</compile_context>

<pallas_src>
import functools

import jax
import jax.numpy as jnp
from jax.experimental import pallas as pl
from jax.experimental.pallas import tpu as pltpu

LANE = 128


def _round_up(x, m):
    return ((x + m - 1) // m) * m


def _custom_loss_kernel(out_ref, tgt_ref, acc_ref, *,
                        block_rows, blocks_per_split, valid_rows):
    c = pl.program_id(0)   # parallel split (maps to a TensorCore on v7x)
    i = pl.program_id(1)   # reduction step within the split

    # Init this split's resident accumulator block on its first step.
    @pl.when(i == 0)
    def _():
        acc_ref[...] = jnp.zeros_like(acc_ref)

    res = out_ref[...].astype(jnp.float32) - tgt_ref[...].astype(jnp.float32)

    # Mask rows past the logical end of the data (partial last block and/or
    # over-assigned split iterations).  Only emitted when actually needed.
    if valid_rows is not None:
        base = (c * blocks_per_split + i) * block_rows
        rid = jax.lax.broadcasted_iota(jnp.int32, res.shape, 0) + base
        res = jnp.where(rid < valid_rows, res, 0.0)

    # Per-step: only a sublane reduce; keep per-lane partials.  Cross-lane
    # reduce + q scaling happen once, in the wrapper.
    relu_p = jnp.sum(jnp.maximum(res, 0.0), axis=0, keepdims=True)   # (1, LANE)
    tot_p = jnp.sum(res, axis=0, keepdims=True)                      # (1, LANE)
    acc_ref[0:1, :] += relu_p
    acc_ref[1:2, :] += tot_p


def custom_loss(output, target, q, *, block_rows=2048, num_splits=2):
    """Pallas implementation of CustomLoss.forward (returns a float32 scalar)."""
    assert output.shape == target.shape

    out_flat = output.reshape(-1)
    tgt_flat = target.reshape(-1)
    n = out_flat.shape[0]
    if n == 0:
        return jnp.zeros((), jnp.float32)

    block_rows = max(_round_up(int(block_rows), 16), 16)
    num_splits = max(int(num_splits), 1)

    rows = pl.cdiv(n, LANE)
    br = min(block_rows, _round_up(rows, 16))   # block sublane extent (mult of 16)
    rows_p = max(rows, br)                      # physical rows of the 2-D slab

    pad = rows_p * LANE - n
    if pad > 0:
        # Pairwise zero padding => padded residuals are exactly 0 and add
        # nothing to either accumulator.  Only triggers for a ragged tail
        # (< LANE elements) or tiny inputs; large aligned inputs reshape
        # copy-free.
        out_flat = jnp.pad(out_flat, (0, pad))
        tgt_flat = jnp.pad(tgt_flat, (0, pad))

    out2d = out_flat.reshape(rows_p, LANE)
    tgt2d = tgt_flat.reshape(rows_p, LANE)

    nb = pl.cdiv(rows_p, br)                    # total row blocks
    bpc = pl.cdiv(nb, num_splits)               # blocks per split
    covered_rows = num_splits * bpc * br
    valid_rows = rows_p if covered_rows != rows_p else None

    def in_idx(c, i):
        # Clamp so over-assigned split iterations re-read a valid block;
        # their contribution is zeroed by the in-kernel row mask.
        return (jnp.minimum(c * bpc + i, nb - 1), 0)

    acc = pl.pallas_call(
        functools.partial(
            _custom_loss_kernel,
            block_rows=br,
            blocks_per_split=bpc,
            valid_rows=valid_rows,
        ),
        out_shape=jax.ShapeDtypeStruct((num_splits * 8, LANE), jnp.float32),
        grid=(num_splits, bpc),
        in_specs=[
            pl.BlockSpec((br, LANE), in_idx),
            pl.BlockSpec((br, LANE), in_idx),
        ],
        out_specs=pl.BlockSpec((8, LANE), lambda c, i: (c, 0)),
        compiler_params=pltpu.CompilerParams(
            dimension_semantics=("parallel", "arbitrary"),
        ),
    )(out2d, tgt2d)

    acc = acc.reshape(num_splits, 8, LANE)
    relu_sum = jnp.sum(acc[:, 0, :])    # sum(max(res, 0))
    tot_sum = jnp.sum(acc[:, 1, :])     # sum(res)
    q = jnp.asarray(q, jnp.float32)     # q may be a traced value (no recompile)
    return relu_sum - q * tot_sum


def custom_loss_ref(output, target, q):
    res = output.astype(jnp.float32) - target.astype(jnp.float32)
    pos = jnp.sum(jnp.where(res > 0, res, 0.0))
    neg = jnp.sum(jnp.where(res <= 0, res, 0.0))
    return (1.0 - q) * pos - q * neg


if __name__ == "__main__":
    key = jax.random.PRNGKey(0)
    k1, k2, k3, k4 = jax.random.split(key, 4)

    q = 0.7  # quantile parameter from CustomLoss.__init__

    # Test 1: small regression-style output (B, C, H, W), f32, lane-aligned.
    shape1 = (2, 4, 16, 16)
    out1 = jax.random.normal(k1, shape1, dtype=jnp.float32)
    tgt1 = jax.random.normal(k2, shape1, dtype=jnp.float32)
    loss1 = custom_loss(out1, tgt1, q)
    jax.block_until_ready(loss1)
    ref1 = custom_loss_ref(out1, tgt1, q)
    assert jnp.allclose(loss1, ref1, rtol=1e-5, atol=1e-4), (loss1, ref1)

    # Test 2: ragged element count + bf16 inputs + multi-block / masked path.
    shape2 = (2, 3, 50, 60)   # n = 18000, not a multiple of 128
    out2 = jax.random.normal(k3, shape2, dtype=jnp.float32).astype(jnp.bfloat16)
    tgt2 = jax.random.normal(k4, shape2, dtype=jnp.float32).astype(jnp.bfloat16)
    loss2 = custom_loss(out2, tgt2, q, block_rows=32)
    jax.block_until_ready(loss2)
    ref2 = custom_loss_ref(out2, tgt2, q)
    assert jnp.allclose(loss2, ref2, rtol=1e-3, atol=1e-2), (loss2, ref2)

    print("KERNEL_OK")
</pallas_src>

<mosaic_0001>
module attributes {stable_mosaic.version = 11 : i64} {
  func.func @_custom_loss_kernel(%arg0: i32, %arg1: i32, %arg2: memref<16x128xf32, #tpu.memory_space<vmem>>, %arg3: memref<16x128xf32, #tpu.memory_space<vmem>>, %arg4: memref<8x128xf32, #tpu.memory_space<vmem>>) attributes {dimension_semantics = [#tpu.dimension_semantics<parallel>, #tpu.dimension_semantics<arbitrary>], iteration_bounds = array<i64: 2, 1>, scalar_prefetch = 0 : i64, scratch_operands = 0 : i64, tpu.core_type = #tpu.core_type<tc>, window_params = [{transform_indices = @transform_0, window_bounds = array<i64: 16, 128>}, {transform_indices = @transform_1, window_bounds = array<i64: 16, 128>}, {transform_indices = @transform_2, window_bounds = array<i64: 8, 128>}]} {
    %c0_i32 = arith.constant 0 : i32
    %0 = arith.cmpi eq, %arg1, %c0_i32 : i32
    %1 = arith.extui %0 : i1 to i32
    %c0_i32_0 = arith.constant 0 : i32
    %2 = arith.cmpi ne, %1, %c0_i32_0 : i32
    scf.if %2 {
      %cst_15 = arith.constant 0.000000e+00 : f32
      %28 = vector.broadcast %cst_15 : f32 to vector<8x128xf32>
      %c0_16 = arith.constant 0 : index
      %c0_17 = arith.constant 0 : index
      %29 = vector.load %arg4[%c0_16, %c0_17] : memref<8x128xf32, #tpu.memory_space<vmem>>, vector<8x128xf32>
      tpu.vector_store %arg4[%c0_16, %c0_17], %28 {strides = array<i32>} : memref<8x128xf32, #tpu.memory_space<vmem>>, vector<8x128xf32>,
    } else {
    }
    %c0 = arith.constant 0 : index
    %c0_1 = arith.constant 0 : index
    %3 = vector.load %arg2[%c0, %c0_1] : memref<16x128xf32, #tpu.memory_space<vmem>>, vector<16x128xf32>
    %c0_2 = arith.constant 0 : index
    %c0_3 = arith.constant 0 : index
    %4 = vector.load %arg3[%c0_2, %c0_3] : memref<16x128xf32, #tpu.memory_space<vmem>>, vector<16x128xf32>
    %5 = arith.subf %3, %4 : vector<16x128xf32>
    %c1_i32 = arith.constant 1 : i32
    %6 = arith.muli %arg0, %c1_i32 : i32
    %7 = arith.addi %6, %arg1 : i32
    %c16_i32 = arith.constant 16 : i32
    %8 = arith.muli %7, %c16_i32 : i32
    %9 = tpu.iota {dimensions = array<i32: 0>} : vector<16x128xi32>
    %10 = vector.broadcast %8 : i32 to vector<16x128xi32>
    %11 = arith.addi %9, %10 : vector<16x128xi32>
    %c16_i32_4 = arith.constant 16 : i32
    %12 = vector.broadcast %c16_i32_4 : i32 to vector<16x128xi32>
    %13 = arith.cmpi slt, %11, %12 : vector<16x128xi32>
    %cst = arith.constant 0.000000e+00 : f32
    %14 = vector.broadcast %cst : f32 to vector<16x128xf32>
    %15 = arith.select %13, %5, %14 : vector<16x128xi1>, vector<16x128xf32>
    %cst_5 = arith.constant 0.000000e+00 : f32
    %16 = vector.broadcast %cst_5 : f32 to vector<16x128xf32>
    %17 = arith.maximumf %15, %16 : vector<16x128xf32>
    %cst_6 = arith.constant dense<0.000000e+00> : vector<128xf32>
    %18 = vector.multi_reduction <add>, %17, %cst_6 [0] : vector<16x128xf32> to vector<128xf32>
    %19 = vector.shape_cast %18 : vector<128xf32> to vector<1x128xf32>
    %cst_7 = arith.constant dense<0.000000e+00> : vector<128xf32>
    %20 = vector.multi_reduction <add>, %15, %cst_7 [0] : vector<16x128xf32> to vector<128xf32>
    %21 = vector.shape_cast %20 : vector<128xf32> to vector<1x128xf32>
    %c0_8 = arith.constant 0 : index
    %c0_9 = arith.constant 0 : index
    %22 = vector.load %arg4[%c0_8, %c0_9] : memref<8x128xf32, #tpu.memory_space<vmem>>, vector<1x128xf32>
    %23 = arith.addf %22, %19 : vector<1x128xf32>
    %c0_10 = arith.constant 0 : index
    %c0_11 = arith.constant 0 : index
    %24 = vector.load %arg4[%c0_10, %c0_11] : memref<8x128xf32, #tpu.memory_space<vmem>>, vector<1x128xf32>
    tpu.vector_store %arg4[%c0_10, %c0_11], %23 {strides = array<i32>} : memref<8x128xf32, #tpu.memory_space<vmem>>, vector<1x128xf32>,
    %c1 = arith.constant 1 : index
    %c0_12 = arith.constant 0 : index
    %25 = vector.load %arg4[%c1, %c0_12] : memref<8x128xf32, #tpu.memory_space<vmem>>, vector<1x128xf32>
    %26 = arith.addf %25, %21 : vector<1x128xf32>
    %c1_13 = arith.constant 1 : index
    %c0_14 = arith.constant 0 : index
    %27 = vector.load %arg4[%c1_13, %c0_14] : memref<8x128xf32, #tpu.memory_space<vmem>>, vector<1x128xf32>
    tpu.vector_store %arg4[%c1_13, %c0_14], %26 {strides = array<i32>} : memref<8x128xf32, #tpu.memory_space<vmem>>, vector<1x128xf32>,
    return
  }
  func.func @transform_0(%arg0: i32, %arg1: i32) -> (i32, i32) {
    %c1_i32 = arith.constant 1 : i32
    %0 = arith.muli %arg0, %c1_i32 : i32
    %1 = arith.addi %0, %arg1 : i32
    %c0_i32 = arith.constant 0 : i32
    %2 = arith.minsi %1, %c0_i32 : i32
    %c0_i32_0 = arith.constant 0 : i32
    %c0_i32_1 = arith.constant 0 : i32
    return %2, %c0_i32_0 : i32, i32
  }
  func.func @transform_1(%arg0: i32, %arg1: i32) -> (i32, i32) {
    %c1_i32 = arith.constant 1 : i32
    %0 = arith.muli %arg0, %c1_i32 : i32
    %1 = arith.addi %0, %arg1 : i32
    %c0_i32 = arith.constant 0 : i32
    %2 = arith.minsi %1, %c0_i32 : i32
    %c0_i32_0 = arith.constant 0 : i32
    %c0_i32_1 = arith.constant 0 : i32
    return %2, %c0_i32_0 : i32, i32
  }
  func.func @transform_2(%arg0: i32, %arg1: i32) -> (i32, i32) {
    %c0_i32 = arith.constant 0 : i32
    %c0_i32_0 = arith.constant 0 : i32
    return %arg0, %c0_i32 : i32, i32
  }
}

</mosaic_0001>

<bundles_post_ra>
// kernel: tpu_custom_call.1
= control target key start
LH: loop header
LB: loop body
LE: loop exit
PB: predicated region body
PF: predicated region fallthrough
CT: control target
= control target key end

     0   :  { %7 = vsyncpa [#allocation3], 0  ;;  %s891_s0 = inlined_call_operand.hbm [shape: f32[16,128], index: 0, kind: input, shape index: {}]   ;;  %s892_s1 = inlined_call_operand.hbm [shape: f32[16,128], index: 1, kind: input, shape index: {}]   ;;  %s893_s2 = inlined_call_operand.hbm [shape: f32[16,128], index: 2, kind: output, shape index: {}]  }
   0x1   :  { %9 = vsyncpa [#allocation3 + $0x1], 0 }
   0x2   :  { %10 = vsyncpa [#allocation6], 0 }
   0x3   :  { %12 = vsyncpa [#allocation6 + $0x1], 0 }
   0x4   :  { %13 = vsyncpa [#allocation4], 0 }
   0x5   :  { %15 = vsyncpa [#allocation4 + $0x1], 0  ;;  %s710_s9 = smov 0   ;;  %s712_s10 = smov 0  }
   0x6   :  { %s714_s11 = smov 0   ;;  %s716_s12 = smov 0  }
   0x7   :  { %s718_s13 = smov 0   ;;  %s720_s14 = smov 0  }
   0x8   :  { %s722_s15 = smov 0   ;;  %s724_s16 = smov 0  }
   0x9 LB: > { %s406_s17 = sadd.s32 4294967295, %s688_s16   ;;  %s407_s18 = sadd.s32 4294967294, %s688_s16   ;;  %s688_s16 = sphi %s724_s16, %s21_s16   ;;  %s684_s15 = sphi %s722_s15, %s905_s15   ;;  %s680_s14 = sphi %s720_s14, %s904_s14   ;;  %s676_s13 = sphi %s718_s13, %s881_s13   ;;  %s672_s12 = sphi %s716_s12, %s903_s12   ;;  %s668_s11 = sphi %s714_s11, %s902_s11   ;;  %s664_s10 = sphi %s712_s10, %s901_s10   ;;  %s660_s9 = sphi %s710_s9, %s900_s9  }
   0xa   : > { %s33_s19 = sadd.s32 1, %s684_s15  ;;  %p657_p1 = scmp.ne.s32.totalorder %s676_s13, 0 }
   0xb   : > { %p35_p0 = scmp.ge.s32.totalorder %s33_s19, 2  ;;  %p54_p2 = scmp.eq.s32.totalorder %s688_s16, 0 }
   0xc   : > { %p59_p3 = scmp.ne.s32.totalorder %s676_s13, %s672_s12  ;;  %p60_p5 = scmp.eq.s32.totalorder %s406_s17, 0 }
   0xd   : > { %s907_s19 = smov (%p35_p0, %s33_s19), 0  ;;  %p756_p4 = por %p657_p1, %p54_p2 }
   0xe   : > { %p760_p6 = por %p60_p5, %p59_p3  ;;  %s101_s22 = ssub.s32 %s684_s15, %s907_s19 }
   0xf   : > { %p102_p7 = scmp.eq.s32.totalorder %s101_s22, 0  ;;  %s104_s23 = sadd.s32 1, %s668_s11 }
  0x10   : > { %p114_p8 = scmp.ne.s32.totalorder %s668_s11, %s664_s10  ;;  %p115_p9 = scmp.eq.s32.totalorder %s406_s17, 1 }
  0x11   : > { %s768_s24 = scalar_select %p102_p7, %s668_s11, %s104_s23  }
  0x12   : > { %p120_p10 = scmp.ne.s32.totalorder %s664_s10, %s660_s9  ;;  %p121_p11 = scmp.eq.s32.totalorder %s407_s18, 1 }
  0x13   : > { %p774_p12 = por %p115_p9, %p114_p8  ;;  %p409_p13 = scmp.ge.s32.totalorder %s688_s16, 2 }
  0x14   : > { %p779_p0 = por %p121_p11, %p120_p10  ;;  %p444_p1 = scmp.lt.s32.totalorder %s688_s16, 2 }
  0x15   : > { %s154_s29 = sshll.u32 %s891_s0, 4  ;;  %s690_s30 = smov [#allocation2]   ;;  %s155_s29 = int_to_ptr.hbm [resolvable:$true] %s154_s29 }
  0x16   : > { %s156_s3 = sshll.u32 %s690_s30, 4  ;;  %p789_p2 = pnand %p444_p1, %p756_p4  ;;  %s157_s3 = int_to_ptr.vmem [resolvable:$true] %s156_s3 }
  0x17   : > { %p416_p3 = scmp.ge.s32.totalorder %s688_s16, 1  ;;  %p189_p5 = scmp.lt.s32.totalorder %s688_s16, 3 }
  0x18   : > { %s521_s5 = sshra.s32 %s155_s29, 4  ;;  %p525_p8 = pneg %p789_p2  ;;  %s522_s5 = int_to_ptr.hbm [resolvable:$true] %s521_s5 }
  0x19   : > { %s523_s6 = scalar_lea.hbm %s522_s5, 16  ;;  %s528_s12 = scalar_lea.hbm %s891_s0, 16 }
  0x1a   : > { %p524_p7 = scmp.ne.s32.totalorder %s522_s5, %s523_s6  ;;  %p530_p4 = scmp.lt.s32.totalorder %s528_s12, %s523_s6 }
  0x1c   : > { %p526_p9 = pnand %p525_p8, %p524_p7 }
  0x1e   : > { %p527_p10 = pneg %p526_p9 }
  0x20   : > { %p532_p11 = pnand %p530_p4, %p527_p10 }
  0x22   : > { %535 = shalt.err (!%p532_p11)
}
  0x23   : > { %s691_s17 = smov 128   ;;  %s692_s18 = smov 8  }
  0x24   : > { %436 = dma.hbm_to_vmem [thread:$0]  (!%p789_p2), %s155_s29, 256, %s157_s3, [#allocation3], %s691_s17, %s691_s17, %s692_s18  }
  0x25   : > { %p809_p1 = pnand %p416_p3, %p189_p5  ;;  %s179_s27 = sshll.u32 %s892_s1, 4  ;;  %s180_s27 = int_to_ptr.hbm [resolvable:$true] %s179_s27 }
  0x26   : > { %s693_s28 = smov [#allocation5]   ;;  %s551_s5 = sshra.s32 %s180_s27, 4  ;;  %s552_s5 = int_to_ptr.hbm [resolvable:$true] %s551_s5 }
  0x27   : > { %s181_s30 = sshll.u32 %s693_s28, 4  ;;  %s553_s6 = scalar_lea.hbm %s552_s5, 16  ;;  %s182_s30 = int_to_ptr.vmem [resolvable:$true] %s181_s30 }
  0x28   : > { %p554_p7 = scmp.ne.s32.totalorder %s552_s5, %s553_s6  ;;  %s558_s7 = scalar_lea.hbm %s892_s1, 16 }
  0x29   : > { %p560_p3 = scmp.lt.s32.totalorder %s558_s7, %s553_s6 }
  0x2a   : > { %p556_p9 = pnand %p554_p7, %p525_p8 }
  0x2c   : > { %p557_p10 = pneg %p556_p9 }
  0x2e   : > { %p562_p5 = pnand %p560_p3, %p557_p10 }
  0x30   : > { %565 = shalt.err (!%p562_p5)
}
  0x31   : > { %439 = dma.hbm_to_vmem [thread:$0]  (!%p789_p2), %s180_s27, 256, %s182_s30, [#allocation6], %s691_s17, %s691_s17, %s692_s18  }
  0x32   : > { %193 = sbr.rel (%p809_p1) target bundleno = 89 (0x59), region = 28  ;;  %s195_s8 = sand.u32 (!%p809_p1), 1, %s676_s13  }
  0x33   : > { %s417_s12 = sshll.u32 (!%p809_p1), %s195_s8, 4  ;;  %s196_s22 = scalar_lea.sflag (!%p809_p1), [#allocation3], %s195_s8 }
  0x34   : > { %s199_s23 = scalar_lea.vmem (!%p809_p1), [#allocation2], %s417_s12 }
  0x37   : > { %646 = dma.done.wait (%p760_p6), %s196_s22, 256  }
  0x38   : > { %648 = vsyncadd (%p760_p6), %s196_s22, 4294967040  ;;  %s206_s28 = scalar_lea.sflag [#allocation6], %s195_s8  ;;  %s209_s5 = scalar_lea.vmem [#allocation5], %s417_s12 }
  0x39   : > { %650 = dma.done.wait (%p760_p6), %s206_s28, 256  }
  0x3a   : > { %652 = vsyncadd (%p760_p6), %s206_s28, 4294967040  ;;  %s233_s4 = sand.u32 1, %s664_s10   ;;  %s420_s17 = sshll.u32 %s680_s14, 4  ;;  %v257_v0 = vlaneseq  ;;  %v694_v3 = vmov 0.0   ;;  %v249_v7 = vld [vmem:[%s199_s23] sm:$0xff]  ;;  %v250_v8 = vld [vmem:[%s199_s23 + $0x8] sm:$0xff] }
  0x3b   : > { %s419_s18 = sshll.u32 %s233_s4, 3  ;;  %v260_v1 = vstv %s420_s17  ;;  %v251_v9 = vld [vmem:[%s209_s5] sm:$0xff]  ;;  %v252_v10 = vld [vmem:[%s209_s5 + $0x8] sm:$0xff]  ;;  %s422_s21 = sshll.u32 %s680_s14, 3 }
  0x3c   : > { %v258_v2 = vshrl.u32 %v257_v0, 7  ;;  %s839_s20 = scalar_lea.vmem [#allocation7], %s419_s18  ;;  %v253_v11 = vsub.f32 %v249_v7, %v251_v9  ;;  %v254_v12 = vsub.f32 %v250_v8, %v252_v10  ;;  %s300_s6 = scalar_lea.hbm %s893_s2, %s422_s21 }
  0x3d   : > { %248 = vst [vmem:[%s839_s20] sm:$0xff] %v694_v3  ;;  %s302_s29 = sshll.u32 %s839_s20, 4  ;;  %s304_s3 = sshll.u32 %s300_s6, 4  ;;  %s303_s29 = int_to_ptr.vmem [resolvable:$true] %s302_s29  ;;  %s305_s3 = int_to_ptr.hbm [resolvable:$true] %s304_s3 }
  0x3e   : > { %v259_v4 = vadd.s32 8, %v258_v2  ;;  %v261_v5 = vadd.s32 %v260_v1, %v258_v2  ;;  %s290_s14 = scalar_lea.sflag [#allocation4], %s233_s4  ;;  %s595_s7 = sshra.s32 %s305_s3, 4  ;;  %s596_s7 = int_to_ptr.hbm [resolvable:$true] %s595_s7 }
  0x3f   : > { %s597_s8 = scalar_lea.hbm %s596_s7, 8  ;;  %s601_s23 = scalar_lea.hbm %s893_s2, 16 }
  0x40   : > { %v262_v6 = vadd.s32 %v260_v1, %v259_v4  ;;  %vm263_vm0 = vcmp.lt.s32.totalorder %v261_v5, 16  ;;  %p598_p6 = scmp.ne.s32.totalorder %s596_s7, %s597_s8  ;;  %p602_p4 = scmp.lt.s32.totalorder %s596_s7, %s893_s2 }
  0x41   : > { %v265_v13 = vsel %vm263_vm0, %v253_v11, 0.0  ;;  %p603_p11 = scmp.lt.s32.totalorder %s601_s23, %s597_s8 }
  0x42   : > { %vm264_vm1 = vcmp.lt.s32.totalorder %v262_v6, 16  ;;  %v267_v15 = vmax.f32 %v265_v13, 0.0  ;;  %p599_p2 = pnand %p598_p6, %p774_p12 }
  0x43   : > { %v266_v14 = vsel %vm264_vm1, %v254_v12, 0.0  ;;  %p604_p1 = por %p603_p11, %p602_p4 }
  0x44   : > { %v268_v16 = vmax.f32 %v266_v14, 0.0  ;;  %v276_v17 = vadd.f32 %v266_v14, %v265_v13  ;;  %v286_v28 = vld [vmem:[%s839_s20 + $0x1] sm:$0x1]  ;;  %v283_v31 = vld [vmem:[%s839_s20] sm:$0x1]  ;;  %p600_p8 = pneg %p599_p2 }
  0x46   : > { %v269_v18 = vadd.f32 %v268_v16, %v267_v15  ;;  %v277_v19 = vrot.slane %v276_v17, 4  ;;  %p605_p7 = pnand %p604_p1, %p600_p8 }
  0x48   : > { %v270_v20 = vrot.slane %v269_v18, 4  ;;  %v278_v21 = vadd.f32 %v277_v19, %v276_v17 }
  0x4a   : > { %v271_v22 = vadd.f32 %v270_v20, %v269_v18  ;;  %v279_v23 = vrot.slane %v278_v21, 2 }
  0x4c   : > { %v272_v24 = vrot.slane %v271_v22, 2  ;;  %v280_v25 = vadd.f32 %v279_v23, %v278_v21 }
  0x4e   : > { %v273_v26 = vadd.f32 %v272_v24, %v271_v22  ;;  %v281_v27 = vrot.slane %v280_v25, 1 }
  0x50   : > { %v274_v29 = vrot.slane %v273_v26, 1  ;;  %v282_v30 = vadd.f32 %v281_v27, %v280_v25 }
  0x52   : > { %v275_v32 = vadd.f32 %v274_v29, %v273_v26  ;;  %v287_v33 = vadd.f32 %v286_v28, %v282_v30 }
  0x54   : > { %v284_v34 = vadd.f32 %v283_v31, %v275_v32  ;;  %288 = vst [vmem:[%s839_s20 + $0x1] sm:$0x1] %v287_v33 }
  0x56   : > { %285 = vst [vmem:[%s839_s20] sm:$0x1] %v284_v34 }
  0x57   : > { %608 = shalt.err (!%p605_p7)
}
  0x58   : > { %431 = dma.vmem_to_hbm [thread:$0]  (%p774_p12), %s303_s29, 128, %s305_s3, %s290_s14  }
  0x59 PF: > { %s316_s4 = sand.u32 1, %s660_s9   ;;  %p441_p9 = pnand %p409_p13, %p779_p0 }
  0x5a   : > { %s317_s17 = scalar_lea.sflag [#allocation4], %s316_s4 }
  0x5b   : > { %p442_p10 = pneg %p441_p9 }
  0x5d   : > { %654 = dma.done.wait (%p442_p10), %s317_s17, 128  }
  0x5e   : > { %656 = vsyncadd (%p442_p10), %s317_s17, 4294967168  ;;  %s21_s16 = sadd.s32 1, %s688_s16   ;;  %s900_s9 = smov %s664_s10 }
  0x5f   : > { %p18_p3 = scmp.ge.s32.totalorder %s21_s16, 4   ;;  %s901_s10 = smov %s668_s11 }
  0x60   : > { %s902_s11 = smov %s768_s24  ;;  %s903_s12 = smov %s676_s13 }
  0x61   : > { %s881_s13 = smov 0   ;;  %s904_s14 = smov %s684_s15 }
  0x62   : > { %s905_s15 = smov %s907_s19  ;;  %20 = sbr.rel (!%p18_p3) target bundleno = 9 (0x9), region = 90 }
  0x67   :  { %323 = vsyncpa [#allocation3], 1 }
  0x68   :  { %325 = vsyncpa [#allocation3 + $0x1], 1 }
  0x69   :  { %326 = vsyncpa [#allocation6], 1 }
  0x6a   :  { %328 = vsyncpa [#allocation6 + $0x1], 1 }
  0x6b   :  { %329 = vsyncpa [#allocation4], 1 }
  0x6c   :  { %331 = vsyncpa [#allocation4 + $0x1], 1 }

</bundles_post_ra>
